<compile_context>
chip_gen: v5e
topology: v5e:2x2
jax: 0.10.0
libtpu: 0.0.40
codegen_flags: <defaults>
</compile_context>

<pallas_src>
import jax
import jax.numpy as jnp
from jax.experimental import pallas as pl
from jax.experimental.pallas import tpu as pltpu


def mlp_kernel(x_ref, w1_ref, b1_ref, w2_ref, b2_ref, o_ref):
    # Layer 1: MXU matmul (f32 accumulate) + VPU bias/ReLU epilogue.
    h = jnp.dot(x_ref[...], w1_ref[...], preferred_element_type=jnp.float32)
    h = jnp.maximum(h + b1_ref[...], 0.0)
    # Layer 2: VPU elementwise multiply + XLU lane reduction (w2 is a (1,H) row).
    # b2 is a scalar read from SMEM (scalar path, frees a vld slot / vreg).
    o = jnp.sum(h * w2_ref[...], axis=-1, keepdims=True) + b2_ref[0, 0]
    # TODO(synk): lane-dense (batch-on-lanes) output staging would remove the
    # lane-width-1 masked stores; second-order here since output bytes are a
    # tiny fraction of the x stream.
    o_ref[...] = o.astype(o_ref.dtype)


def simple_nn_forward(x, w1, b1, w2, b2, *, tile_b=2048, cast_to_bf16=False):
    """x: (B, D); w1: (D, H); b1: (H,); w2: (H, 1); b2: (1,). Returns (B, 1)."""
    B, D = x.shape
    H = w1.shape[1]
    out_dtype = x.dtype

    if cast_to_bf16:
        # Halve the dominant HBM stream; the in-kernel accumulate and the
        # bias/ReLU/reduce epilogue remain f32.
        x = x.astype(jnp.bfloat16)
        w1 = w1.astype(jnp.bfloat16)

    b1_2d = b1.reshape(1, H).astype(jnp.float32)
    w2_row = w2.reshape(1, H).astype(jnp.float32)   # layer-2 weight as a lane vector
    b2_2d = b2.reshape(1, 1).astype(jnp.float32)    # scalar, lives in SMEM

    bytes_accessed = (
        x.size * x.dtype.itemsize
        + w1.size * w1.dtype.itemsize
        + b1_2d.size * 4 + w2_row.size * 4 + b2_2d.size * 4
        + B * jnp.dtype(out_dtype).itemsize
    )
    cost = pl.CostEstimate(
        flops=2 * B * D * H + 2 * B * H,
        transcendentals=0,
        bytes_accessed=bytes_accessed,
    )

    if B <= tile_b:
        # Latency-bound regime: single block, no grid, everything VMEM-resident.
        return pl.pallas_call(
            mlp_kernel,
            out_shape=jax.ShapeDtypeStruct((B, 1), out_dtype),
            in_specs=[
                pl.BlockSpec(memory_space=pltpu.MemorySpace.VMEM),  # x
                pl.BlockSpec(memory_space=pltpu.MemorySpace.VMEM),  # w1
                pl.BlockSpec(memory_space=pltpu.MemorySpace.VMEM),  # b1 (1,H)
                pl.BlockSpec(memory_space=pltpu.MemorySpace.VMEM),  # w2 (1,H)
                pl.BlockSpec(memory_space=pltpu.MemorySpace.SMEM),  # b2 scalar
            ],
            out_specs=pl.BlockSpec(memory_space=pltpu.MemorySpace.VMEM),
            cost_estimate=cost,
        )(x, w1, b1_2d, w2_row, b2_2d)

    # Batch-tiled path: NO input pad copy. Pallas handles the ragged last block
    # (out-of-range rows are never written back; garbage tail rows in the input
    # block are row-independent and discarded). Weights/biases are pinned at
    # block (0,0) so they are DMA'd once and stay VMEM-resident.
    # NOTE: weight specs could be single-buffered via pipeline_mode=pl.Buffered(1);
    # skipped as a ~48 KB hygiene-only win at this H.
    TB = tile_b
    grid = (pl.cdiv(B, TB),)

    return pl.pallas_call(
        mlp_kernel,
        out_shape=jax.ShapeDtypeStruct((B, 1), out_dtype),
        grid=grid,
        in_specs=[
            pl.BlockSpec((TB, D), lambda i: (i, 0)),                # x tile (streamed)
            pl.BlockSpec((D, H), lambda i: (0, 0)),                 # w1 (resident)
            pl.BlockSpec((1, H), lambda i: (0, 0)),                 # b1 (resident)
            pl.BlockSpec((1, H), lambda i: (0, 0)),                 # w2 (resident)
            pl.BlockSpec(memory_space=pltpu.MemorySpace.SMEM),      # b2 scalar
        ],
        out_specs=pl.BlockSpec((TB, 1), lambda i: (i, 0)),
        # TODO(synk): on v7x, pltpu.CORE_PARALLEL on the batch axis would
        # guarantee both TensorCores are used; "parallel" is the portable choice.
        compiler_params=pltpu.CompilerParams(
            dimension_semantics=("parallel",),
        ),
        cost_estimate=cost,
    )(x, w1, b1_2d, w2_row, b2_2d)


def init_params(key, input_dim, hidden_size):
    """Deterministic init mirroring nn.Linear's U(-1/sqrt(fan_in), 1/sqrt(fan_in))."""
    k1, k2, k3, k4 = jax.random.split(key, 4)
    lim1 = 1.0 / jnp.sqrt(input_dim)
    lim2 = 1.0 / jnp.sqrt(hidden_size)
    w1 = jax.random.uniform(k1, (input_dim, hidden_size), jnp.float32, -lim1, lim1)
    b1 = jax.random.uniform(k2, (hidden_size,), jnp.float32, -lim1, lim1)
    w2 = jax.random.uniform(k3, (hidden_size, 1), jnp.float32, -lim2, lim2)
    b2 = jax.random.uniform(k4, (1,), jnp.float32, -lim2, lim2)
    return w1, b1, w2, b2


def _reference(x, w1, b1, w2, b2):
    # HIGHEST precision so the f32 reference matches the kernel's f32 accumulate
    # regardless of the environment's default matmul precision.
    h = jnp.maximum(jnp.dot(x, w1, precision=jax.lax.Precision.HIGHEST) + b1, 0.0)
    return jnp.dot(h, w2, precision=jax.lax.Precision.HIGHEST) + b2


if __name__ == "__main__":
    key = jax.random.PRNGKey(0)
    kx1, kx2, kp = jax.random.split(key, 3)

    INPUT_DIM, HIDDEN = 32, 512   # HIDDEN matches the module's default hidden_size
    w1, b1, w2, b2 = init_params(kp, INPUT_DIM, HIDDEN)
    fwd = jax.jit(simple_nn_forward, static_argnames=("tile_b", "cast_to_bf16"))

    # 1) Small batch -> single-block, latency-optimized path (no grid).
    B_small = 8
    x_small = jax.random.normal(kx1, (B_small, INPUT_DIM), jnp.float32)
    out_small = jax.block_until_ready(fwd(x_small, w1, b1, w2, b2))
    ref_small = _reference(x_small, w1, b1, w2, b2)
    assert out_small.shape == (B_small, 1)
    assert jnp.allclose(out_small, ref_small, atol=1e-4, rtol=1e-4)

    # 2) Larger, non-tile-multiple batch -> grid path with a ragged (masked)
    #    last block and NO input pad copy (2 grid steps at tile_b=2048).
    B_big = 2560
    x_big = jax.random.normal(kx2, (B_big, INPUT_DIM), jnp.float32)
    out_big = jax.block_until_ready(fwd(x_big, w1, b1, w2, b2, tile_b=2048))
    ref_big = _reference(x_big, w1, b1, w2, b2)
    assert out_big.shape == (B_big, 1)
    assert jnp.allclose(out_big, ref_big, atol=1e-4, rtol=1e-4)

    # 3) Same batch with a bf16 HBM stream for x/W1 (f32 accumulate/epilogue
    #    in-kernel); looser tolerance vs. the f32 reference.
    out_bf16 = jax.block_until_ready(
        fwd(x_big, w1, b1, w2, b2, tile_b=2048, cast_to_bf16=True))
    assert out_bf16.shape == (B_big, 1)
    assert jnp.allclose(out_bf16, ref_big, atol=3e-2, rtol=3e-2)

    print("KERNEL_OK")
</pallas_src>

<mosaic_0001>
module attributes {stable_mosaic.version = 11 : i64} {
  func.func @mlp_kernel(%arg0: memref<8x32xf32, #tpu.memory_space<vmem>>, %arg1: memref<32x512xf32, #tpu.memory_space<vmem>>, %arg2: memref<1x512xf32, #tpu.memory_space<vmem>>, %arg3: memref<1x512xf32, #tpu.memory_space<vmem>>, %arg4: memref<1x1xf32, #tpu.memory_space<smem>>, %arg5: memref<8x1xf32, #tpu.memory_space<vmem>>) attributes {dimension_semantics = [], scalar_prefetch = 0 : i64, scratch_operands = 0 : i64, tpu.core_type = #tpu.core_type<tc>} {
    %c0 = arith.constant 0 : index
    %c0_0 = arith.constant 0 : index
    %0 = vector.load %arg0[%c0, %c0_0] : memref<8x32xf32, #tpu.memory_space<vmem>>, vector<8x32xf32>
    %c0_1 = arith.constant 0 : index
    %c0_2 = arith.constant 0 : index
    %1 = vector.load %arg1[%c0_1, %c0_2] : memref<32x512xf32, #tpu.memory_space<vmem>>, vector<32x512xf32>
    %cst = arith.constant dense<0.000000e+00> : vector<8x512xf32>
    %2 = tpu.matmul %0, %1, %cst {dimension_numbers = #tpu.dot_dimension_numbers<[1], [0], [0], [1], [0, 0, 1, 1], [], []>} : vector<8x32xf32>, vector<32x512xf32>, vector<8x512xf32> -> vector<8x512xf32>
    %c0_3 = arith.constant 0 : index
    %c0_4 = arith.constant 0 : index
    %3 = vector.load %arg2[%c0_3, %c0_4] : memref<1x512xf32, #tpu.memory_space<vmem>>, vector<1x512xf32>
    %4 = vector.broadcast %3 : vector<1x512xf32> to vector<8x512xf32>
    %5 = arith.addf %2, %4 : vector<8x512xf32>
    %cst_5 = arith.constant 0.000000e+00 : f32
    %6 = vector.broadcast %cst_5 : f32 to vector<8x512xf32>
    %7 = arith.maximumf %5, %6 : vector<8x512xf32>
    %c0_6 = arith.constant 0 : index
    %c0_7 = arith.constant 0 : index
    %8 = vector.load %arg3[%c0_6, %c0_7] : memref<1x512xf32, #tpu.memory_space<vmem>>, vector<1x512xf32>
    %9 = vector.broadcast %8 : vector<1x512xf32> to vector<8x512xf32>
    %10 = arith.mulf %7, %9 : vector<8x512xf32>
    %cst_8 = arith.constant dense<0.000000e+00> : vector<8xf32>
    %11 = vector.multi_reduction <add>, %10, %cst_8 [1] : vector<8x512xf32> to vector<8xf32>
    %12 = vector.shape_cast %11 : vector<8xf32> to vector<8x1xf32>
    %c0_9 = arith.constant 0 : index
    %c0_10 = arith.constant 0 : index
    %13 = memref.load %arg4[%c0_9, %c0_10] : memref<1x1xf32, #tpu.memory_space<smem>>
    %14 = vector.broadcast %13 : f32 to vector<8x1xf32>
    %15 = arith.addf %12, %14 : vector<8x1xf32>
    %c0_11 = arith.constant 0 : index
    %c0_12 = arith.constant 0 : index
    %16 = vector.load %arg5[%c0_11, %c0_12] : memref<8x1xf32, #tpu.memory_space<vmem>>, vector<8x1xf32>
    tpu.vector_store %arg5[%c0_11, %c0_12], %15 {strides = array<i32>} : memref<8x1xf32, #tpu.memory_space<vmem>>, vector<8x1xf32>,
    return
  }
}

</mosaic_0001>

<bundles_post_ra>
// kernel: simple_nn_forward.1
= control target key start
LH: loop header
LB: loop body
LE: loop exit
PB: predicated region body
PF: predicated region fallthrough
CT: control target
= control target key end

     0   :  { %11 = vsyncpa [#allocation4], 0  ;;  %s347_s0 = inlined_call_operand.hbm [shape: f32[8,32], index: 0, kind: input, shape index: {}]   ;;  %s348_s1 = inlined_call_operand.hbm [shape: f32[32,512], index: 1, kind: input, shape index: {}]   ;;  %s349_s2 = inlined_call_operand.vmem [shape: f32[1,512], index: 2, kind: input, shape index: {}]   ;;  %s350_s3 = inlined_call_operand.hbm [shape: f32[1,512], index: 3, kind: input, shape index: {}]   ;;  %s351_s4 = inlined_call_operand.<no memory space> [shape: f32[1,1], index: 4, kind: input, shape index: {}]   ;;  %s352_s5 = inlined_call_operand.vmem [shape: f32[8,1], index: 5, kind: output, shape index: {}]  }
   0x1   :  { %12 = vsyncpa [#allocation6], 0  ;;  %s28_s20 = sshll.u32 %s348_s1, 4  ;;  %s294_s21 = smov [#allocation5]   ;;  %s29_s20 = int_to_ptr.hbm [resolvable:$true] %s28_s20 }
   0x2   :  { %s30_s22 = sshll.u32 %s294_s21, 4  ;;  %s18_s25 = sshll.u32 %s347_s0, 4  ;;  %s31_s22 = int_to_ptr.vmem [resolvable:$true] %s30_s22  ;;  %s19_s25 = int_to_ptr.hbm [resolvable:$true] %s18_s25 }
   0x3   :  { %s295_s26 = smov 512   ;;  %s296_s27 = smov 32  }
   0x4   :  { %36 = dma.hbm_to_vmem [thread:$0]  %s29_s20, 2048, %s31_s22, [#allocation6], %s295_s26, %s295_s26, %s296_s27  }
   0x5   :  { %s297_s28 = smov [#allocation3]   ;;  %s44_s7 = sshll.u32 %s350_s3, 4  ;;  %s45_s7 = int_to_ptr.hbm [resolvable:$true] %s44_s7 }
   0x6   :  { %s20_s29 = sshll.u32 %s297_s28, 4  ;;  %s298_s1 = smov [#allocation7]   ;;  %s21_s29 = int_to_ptr.vmem [resolvable:$true] %s20_s29 }
   0x7   :  { %23 = dma.hbm_to_vmem [thread:$0]  %s19_s25, 128, %s21_s29, [#allocation4]  }
   0x8   :  { %s46_s8 = sshll.u32 %s298_s1, 4  ;;  %s47_s8 = int_to_ptr.vmem [resolvable:$true] %s46_s8 }
   0x9   :  { %49 = dma.hbm_to_vmem [thread:$0]  %s45_s7, 64, %s47_s8, [#allocation6]  }
   0xa   :  { %290 = dma.done.wait [#allocation4], 128  }
   0xb   :  { %291 = vsyncadd [#allocation4], 4294967168 }
   0xc   :  { %292 = dma.done.wait [#allocation6], 2112  }
   0xd   :  { %293 = vsyncadd [#allocation6], 4294965184  ;;  %v79_v0 = vld [vmem:[#allocation5 + $0x70] sm:$0xff]  ;;  %v80_v2 = vld [vmem:[#allocation5 + $0x78] sm:$0xff]  ;;  %vm91_vm0 = vcmask 261120   ;;  %v199_v46 = vstv %s351_s4  ;;  %vm201_vm1 = vcmask 7168  }
   0xe   :  { %v75_v1 = vld [vmem:[#allocation5 + $0x50] sm:$0xff]  ;;  %147 = vmatpush.msra.mxu2 %v79_v0  ;;  %167 = vmatpush.msra.mxu3 %v80_v2  ;;  %v77_v3 = vld [vmem:[#allocation5 + $0x60] sm:$0xff]  ;;  %v78_v4 = vld [vmem:[#allocation5 + $0x68] sm:$0xff] }
   0xf   :  { %v71_v5 = vld [vmem:[#allocation5 + $0x30] sm:$0xff]  ;;  %107 = vmatpush.msra.mxu0 %v77_v3  ;;  %127 = vmatpush.msra.mxu1 %v78_v4  ;;  %v76_v6 = vld [vmem:[#allocation5 + $0x58] sm:$0xff]  ;;  %v73_v7 = vld [vmem:[#allocation5 + $0x40] sm:$0xff] }
  0x10   :  { %v74_v8 = vld [vmem:[#allocation5 + $0x48] sm:$0xff]  ;;  %148 = vmatpush.msra.mxu2 %v75_v1  ;;  %168 = vmatpush.msra.mxu3 %v76_v6  ;;  %v67_v9 = vld [vmem:[#allocation5 + $0x10] sm:$0xff]  ;;  %v72_v10 = vld [vmem:[#allocation5 + $0x38] sm:$0xff] }
  0x11   :  { %108 = vmatpush.msra.mxu0 %v73_v7  ;;  %128 = vmatpush.msra.mxu1 %v74_v8  ;;  %v69_v11 = vld [vmem:[#allocation5 + $0x20] sm:$0xff]  ;;  %v70_v12 = vld [vmem:[#allocation5 + $0x28] sm:$0xff]  ;;  %v68_v13 = vld [vmem:[#allocation5 + $0x18] sm:$0xff] }
  0x12   :  { %149 = vmatpush.msra.mxu2 %v71_v5  ;;  %169 = vmatpush.msra.mxu3 %v72_v10  ;;  %v64_v14 = vld [vmem:[#allocation3] sm:$0xff]  ;;  %v65_v15 = vld [vmem:[#allocation5] sm:$0xff]  ;;  %v66_v16 = vld [vmem:[#allocation5 + $0x8] sm:$0xff] }
  0x13   :  { %109 = vmatpush.msra.mxu0 %v69_v11  ;;  %129 = vmatpush.msra.mxu1 %v70_v12  ;;  %v81_v17 = vld [vmem:[%s349_s2] sm:$0xf]  ;;  %v179_v19 = vld [vmem:[#allocation7] sm:$0xf] }
  0x14   :  { %150 = vmatpush.msra.mxu2 %v67_v9  ;;  %170 = vmatpush.msra.mxu3 %v68_v13  ;;  %v83_v18 = vperm.slane %v81_v17, 0  ;;  %v84_v20 = vperm.slane %v81_v17, 1  ;;  %v181_v22 = vperm.slane %v179_v19, 0  ;;  %v85_v24 = vperm.slane %v81_v17, 2 }
  0x15   :  { %211 = vmatmul.msk.f32.vlgmr.msra.gmra.mxu2 %vm91_vm0, %v64_v14  ;;  %212 = vmatmul.msk.f32.vlgmr.msra.gmra.mxu3 %vm91_vm0, %v64_v14  ;;  %v182_v27 = vperm.slane %v179_v19, 1  ;;  %v86_v28 = vperm.slane %v81_v17, 3  ;;  %v183_v32 = vperm.slane %v179_v19, 2  ;;  %v184_v34 = vperm.slane %v179_v19, 3 }
  0x16   :  { %110 = vmatpush.msra.mxu0 %v65_v15  ;;  %130 = vmatpush.msra.mxu1 %v66_v16 }
  0x17   :  { %209 = vmatmul.msk.f32.vlgmr.msra.gmra.mxu0 %vm91_vm0, %v64_v14  ;;  %210 = vmatmul.msk.f32.vlgmr.msra.gmra.mxu1 %vm91_vm0, %v64_v14 }
  0x94   :  { %v112_v21 = vpop.f32.mrf.mxu0  ;;  %v132_v23 = vpop.f32.mrf.mxu1 }
  0x95   :  { %v113_v25 = vadd.f32 %v112_v21, %v83_v18  ;;  %v133_v26 = vadd.f32 %v132_v23, %v84_v20 }
  0x97   :  { %v175_v29 = vmax.f32 %v113_v25, 0.0  ;;  %v176_v30 = vmax.f32 %v133_v26, 0.0 }
  0x98   :  { %v152_v31 = vpop.f32.mrf.mxu2  ;;  %v172_v33 = vpop.f32.mrf.mxu3 }
  0x99   :  { %v189_v35 = vmul.f32 %v181_v22, %v175_v29  ;;  %v190_v36 = vmul.f32 %v182_v27, %v176_v30  ;;  %v153_v37 = vadd.f32 %v152_v31, %v85_v24  ;;  %v173_v38 = vadd.f32 %v172_v33, %v86_v28 }
  0x9b   :  { %v177_v39 = vmax.f32 %v153_v37, 0.0  ;;  %v178_v40 = vmax.f32 %v173_v38, 0.0  ;;  %v193_v41 = vadd.f32 %v190_v36, %v189_v35 }
  0x9d   :  { %v191_v42 = vmul.f32 %v183_v32, %v177_v39  ;;  %v192_v43 = vmul.f32 %v184_v34, %v178_v40 }
  0x9f   :  { %v194_v44 = vadd.f32 %v193_v41, %v191_v42 }
  0xa1   :  { %v195_v45 = vadd.f32 %v194_v44, %v192_v43 }
  0xa3   :  { %196 = vadd.xlane.f32.xlu0 %v195_v45 }
 0x116   :  { %v197_v47 = vpop.xlane.xlu0 %196 }
 0x117   :  { %v200_v48 = vadd.f32 %v199_v46, %v197_v47 }
 0x119   :  { %202 = vst.msk [vmem:[%s352_s5] sm:$0xff] %vm201_vm1, %v200_v48 }
 0x11a   :  { %207 = vsyncpa [#allocation4], 1 }
 0x11b   :  { %208 = vsyncpa [#allocation6], 1 }

</bundles_post_ra>
